<compile_context>
chip_gen: v5e
topology: v5e:2x2
jax: 0.10.0
libtpu: 0.0.40
codegen_flags: <defaults>
</compile_context>

<pallas_src>
import jax
import jax.numpy as jnp
from jax import lax
from jax.experimental import pallas as pl
from jax.experimental.pallas import tpu as pltpu


# ---------------------------------------------------------------------------
# Kernel 1: GRU recurrence, time-chunked grid.
# ---------------------------------------------------------------------------
def _gru_kernel(x_ref, wih_ref, whh_ref, bih_ref, bhh_ref, h_out_ref, h_scr):
    chunk_idx = pl.program_id(0)

    @pl.when(chunk_idx == 0)
    def _():
        h_scr[...] = jnp.zeros_like(h_scr)          # PyTorch default h0 = 0

    u = h_scr.shape[-1]
    t_chunk = h_out_ref.shape[0]

    wih = wih_ref[...]                              # (D, 3U) resident
    whh = whh_ref[...]                              # (U, 3U) resident
    # r/z gate biases always appear summed -> combine once per chunk.
    b_rz = bih_ref[:, 0:2 * u] + bhh_ref[:, 0:2 * u]   # (1, 2U)
    b_in = bih_ref[:, 2 * u:3 * u]                     # (1, U)
    b_hn = bhh_ref[:, 2 * u:3 * u]                     # (1, U)

    h = h_scr[...]                                  # (B, U)
    for j in range(t_chunk):                        # static unroll over chunk
        x_t = x_ref[j]                              # (B, D)
        gi = jnp.dot(x_t, wih, preferred_element_type=jnp.float32)   # (B, 3U)
        gh = jnp.dot(h, whh, preferred_element_type=jnp.float32)     # (B, 3U)
        rz = jax.nn.sigmoid(gi[:, 0:2 * u] + gh[:, 0:2 * u] + b_rz)
        r = rz[:, 0:u]
        z = rz[:, u:2 * u]
        n = jnp.tanh(gi[:, 2 * u:3 * u] + b_in + r * (gh[:, 2 * u:3 * u] + b_hn))
        h = (1.0 - z) * n + z * h
        h_out_ref[j] = h.astype(h_out_ref.dtype)

    h_scr[...] = h                                  # carry to next chunk


def _time_chunk(n, max_chunk=16):
    for c in range(min(n, max_chunk), 0, -1):
        if n % c == 0:
            return c
    return 1


def gru_forward(x_nbd, wih_t, whh_t, b_ih, b_hh, *, max_chunk=16):
    """x_nbd: (N, B, D) f32.  Returns H in (N, B, U) layout."""
    N, B, D = x_nbd.shape
    U3 = wih_t.shape[1]
    U = U3 // 3
    TC = _time_chunk(N, max_chunk)
    return pl.pallas_call(
        _gru_kernel,
        out_shape=jax.ShapeDtypeStruct((N, B, U), jnp.float32),
        grid_spec=pltpu.PrefetchScalarGridSpec(
            num_scalar_prefetch=0,
            grid=(N // TC,),
            in_specs=[
                pl.BlockSpec((TC, B, D), lambda t: (t, 0, 0)),   # x chunk streamed
                pl.BlockSpec((D, U3), lambda t: (0, 0)),         # weights resident
                pl.BlockSpec((U, U3), lambda t: (0, 0)),
                pl.BlockSpec((1, U3), lambda t: (0, 0)),
                pl.BlockSpec((1, U3), lambda t: (0, 0)),
            ],
            out_specs=pl.BlockSpec((TC, B, U), lambda t: (t, 0, 0)),
            scratch_shapes=[pltpu.VMEM((B, U), jnp.float32)],
        ),
        compiler_params=pltpu.CompilerParams(
            dimension_semantics=("arbitrary",)),   # sequential recurrence
    )(x_nbd, wih_t, whh_t, b_ih, b_hh)


# ---------------------------------------------------------------------------
# Kernel 2: structured self-attention + MLP + softmax, one batch element per
# grid step ("parallel").
# ---------------------------------------------------------------------------
def _attn_mlp_kernel(h_ref, ws1_ref, ws2_ref, w1_ref, b1_ref, w2_ref, b2_ref,
                     lab_ref):
    H = h_ref[0]                                                 # (N, U)
    # S = tanh(Ws1 @ H^T): contract U directly, no explicit transpose.
    S = jnp.tanh(lax.dot_general(
        ws1_ref[...], H, (((1,), (1,)), ((), ())),
        preferred_element_type=jnp.float32))                     # (DA, N)
    scores = jnp.dot(ws2_ref[...], S,
                     preferred_element_type=jnp.float32)         # (R, N)
    # softmax over the sequence axis (torch dim=2)
    m = jnp.max(scores, axis=-1, keepdims=True)
    e = jnp.exp(scores - m)
    A = e / jnp.sum(e, axis=-1, keepdims=True)                   # (R, N)
    M = jnp.dot(A, H, preferred_element_type=jnp.float32)        # (R, U)

    # MLP on flattened M without an in-kernel reshape:
    #   flat(1, R*U) @ W1(R*U, MLP)  ==  sum_j  M[j:j+1, :] @ W1_3d[j]
    R = M.shape[0]
    h1 = b1_ref[...]                                             # (1, MLP)
    for j in range(R):                                           # static unroll
        h1 = h1 + jnp.dot(M[j:j + 1, :], w1_ref[j],
                          preferred_element_type=jnp.float32)
    h1 = jnp.maximum(h1, 0.0)                  # ReLU; Dropout is identity in eval
    logits = jnp.dot(h1, w2_ref[...],
                     preferred_element_type=jnp.float32) + b2_ref[...]   # (1, L)
    lm = jnp.max(logits, axis=-1, keepdims=True)
    le = jnp.exp(logits - lm)
    lab_ref[0] = (le / jnp.sum(le, axis=-1, keepdims=True)).astype(lab_ref.dtype)


def attn_mlp_forward(h_bnu, ws1, ws2, w1_3d, b1, w2_t, b2):
    B, N, U = h_bnu.shape
    DA = ws1.shape[0]
    R = ws2.shape[0]
    MLP = w1_3d.shape[-1]
    L = w2_t.shape[-1]
    out = pl.pallas_call(
        _attn_mlp_kernel,
        out_shape=jax.ShapeDtypeStruct((B, 1, L), jnp.float32),
        grid_spec=pltpu.PrefetchScalarGridSpec(
            num_scalar_prefetch=0,
            grid=(B,),
            in_specs=[
                pl.BlockSpec((1, N, U), lambda i: (i, 0, 0)),    # H[b] streamed
                pl.BlockSpec((DA, U), lambda i: (0, 0)),         # weights resident
                pl.BlockSpec((R, DA), lambda i: (0, 0)),
                pl.BlockSpec((R, U, MLP), lambda i: (0, 0, 0)),
                pl.BlockSpec((1, MLP), lambda i: (0, 0)),
                pl.BlockSpec((MLP, L), lambda i: (0, 0)),
                pl.BlockSpec((1, L), lambda i: (0, 0)),
            ],
            out_specs=pl.BlockSpec((1, 1, L), lambda i: (i, 0, 0)),
        ),
        compiler_params=pltpu.CompilerParams(
            dimension_semantics=("parallel",)),
    )(h_bnu, ws1, ws2, w1_3d, b1, w2_t, b2)
    return out[:, 0, :]


def rnn_self_attn_forward(embedding, params):
    """embedding: (B, N, D) f32 (already dense, so pad_sequence is identity)."""
    x_nbd = jnp.transpose(embedding, (1, 0, 2))                  # time-major for streaming
    H_nbu = gru_forward(x_nbd, params['wih_t'], params['whh_t'],
                        params['b_ih'], params['b_hh'])
    H_bnu = jnp.transpose(H_nbu, (1, 0, 2))
    return attn_mlp_forward(H_bnu, params['ws1'], params['ws2'],
                            params['w1_3d'], params['b1'],
                            params['w2_t'], params['b2'])


# ---------------------------------------------------------------------------
# Pure-JAX reference for correctness checking.
# ---------------------------------------------------------------------------
def reference_forward(embedding, params):
    wih_t, whh_t = params['wih_t'], params['whh_t']
    b_ih, b_hh = params['b_ih'], params['b_hh']
    U = whh_t.shape[0]

    def cell(h, x_t):
        gi = x_t @ wih_t + b_ih
        gh = h @ whh_t + b_hh
        r = jax.nn.sigmoid(gi[:, 0:U] + gh[:, 0:U])
        z = jax.nn.sigmoid(gi[:, U:2 * U] + gh[:, U:2 * U])
        n = jnp.tanh(gi[:, 2 * U:3 * U] + r * gh[:, 2 * U:3 * U])
        h_new = (1.0 - z) * n + z * h
        return h_new, h_new

    B = embedding.shape[0]
    x_nbd = jnp.transpose(embedding, (1, 0, 2))
    h0 = jnp.zeros((B, U), jnp.float32)
    _, H_nbu = lax.scan(cell, h0, x_nbd)
    H = jnp.transpose(H_nbu, (1, 0, 2))                          # (B, N, U)

    S = jnp.tanh(jnp.einsum('au,bnu->ban', params['ws1'], H))
    scores = jnp.einsum('ra,ban->brn', params['ws2'], S)
    A = jax.nn.softmax(scores, axis=2)
    M = jnp.einsum('brn,bnu->bru', A, H)
    R, Uu = M.shape[1], M.shape[2]
    flat = M.reshape(B, R * Uu)
    w1_flat = params['w1_3d'].reshape(R * Uu, -1)
    h1 = jnp.maximum(flat @ w1_flat + params['b1'], 0.0)
    logits = h1 @ params['w2_t'] + params['b2']
    return jax.nn.softmax(logits, axis=1)


if __name__ == "__main__":
    # Small shapes consistent with the module's forward.
    B, N, D = 2, 8, 32       # batch, seq_len, embedding_size
    U = 32                   # rnn_hidden_size (single-layer, unidirectional GRU)
    DA, R = 16, 4            # param_da, param_r
    MLP, L = 64, 4           # mlp_hidden_size, num_labels

    key = jax.random.PRNGKey(0)
    ks = jax.random.split(key, 11)
    sc = 0.1
    params = dict(
        wih_t=sc * jax.random.normal(ks[0], (D, 3 * U), jnp.float32),
        whh_t=sc * jax.random.normal(ks[1], (U, 3 * U), jnp.float32),
        b_ih=sc * jax.random.normal(ks[2], (1, 3 * U), jnp.float32),
        b_hh=sc * jax.random.normal(ks[3], (1, 3 * U), jnp.float32),
        ws1=jax.random.normal(ks[4], (DA, U), jnp.float32),      # torch.randn(da, u)
        ws2=jax.random.normal(ks[5], (R, DA), jnp.float32),      # torch.randn(r, da)
        w1_3d=sc * jax.random.normal(ks[6], (R, U, MLP), jnp.float32),
        b1=sc * jax.random.normal(ks[7], (1, MLP), jnp.float32),
        w2_t=sc * jax.random.normal(ks[8], (MLP, L), jnp.float32),
        b2=sc * jax.random.normal(ks[9], (1, L), jnp.float32),
    )
    embedding = jax.random.normal(ks[10], (B, N, D), jnp.float32)

    labels = rnn_self_attn_forward(embedding, params)
    labels = jax.block_until_ready(labels)

    ref = reference_forward(embedding, params)
    assert labels.shape == (B, L), labels.shape
    assert jnp.allclose(labels, ref, rtol=1e-4, atol=1e-4), (labels, ref)

    print("KERNEL_OK")
</pallas_src>

<mosaic_0001>
module attributes {stable_mosaic.version = 11 : i64} {
  func.func @_gru_kernel(%arg0: i32, %arg1: memref<8x2x32xf32, #tpu.memory_space<vmem>>, %arg2: memref<32x96xf32, #tpu.memory_space<vmem>>, %arg3: memref<32x96xf32, #tpu.memory_space<vmem>>, %arg4: memref<1x96xf32, #tpu.memory_space<vmem>>, %arg5: memref<1x96xf32, #tpu.memory_space<vmem>>, %arg6: memref<8x2x32xf32, #tpu.memory_space<vmem>>, %arg7: memref<2x32xf32, #tpu.memory_space<vmem>>) attributes {dimension_semantics = [#tpu.dimension_semantics<arbitrary>], iteration_bounds = array<i64: 1>, scalar_prefetch = 0 : i64, scratch_operands = 1 : i64, tpu.core_type = #tpu.core_type<tc>, window_params = [{transform_indices = @transform_0, window_bounds = array<i64: 8, 2, 32>}, {pipeline_mode = #tpu.pipeline_mode<synchronous>, transform_indices = @transform_1, window_bounds = array<i64: 32, 96>}, {pipeline_mode = #tpu.pipeline_mode<synchronous>, transform_indices = @transform_2, window_bounds = array<i64: 32, 96>}, {pipeline_mode = #tpu.pipeline_mode<synchronous>, transform_indices = @transform_3, window_bounds = array<i64: 1, 96>}, {pipeline_mode = #tpu.pipeline_mode<synchronous>, transform_indices = @transform_4, window_bounds = array<i64: 1, 96>}, {transform_indices = @transform_5, window_bounds = array<i64: 8, 2, 32>}]} {
    %c0_i32 = arith.constant 0 : i32
    %0 = arith.cmpi eq, %arg0, %c0_i32 : i32
    %1 = arith.extui %0 : i1 to i32
    %c0_i32_0 = arith.constant 0 : i32
    %2 = arith.cmpi ne, %1, %c0_i32_0 : i32
    scf.if %2 {
      %cst_87 = arith.constant 0.000000e+00 : f32
      %276 = vector.broadcast %cst_87 : f32 to vector<2x32xf32>
      %c0_88 = arith.constant 0 : index
      %c0_89 = arith.constant 0 : index
      %277 = vector.load %arg7[%c0_88, %c0_89] : memref<2x32xf32, #tpu.memory_space<vmem>>, vector<2x32xf32>
      tpu.vector_store %arg7[%c0_88, %c0_89], %276 {strides = array<i32>} : memref<2x32xf32, #tpu.memory_space<vmem>>, vector<2x32xf32>,
    } else {
    }
    %c0 = arith.constant 0 : index
    %c0_1 = arith.constant 0 : index
    %3 = vector.load %arg2[%c0, %c0_1] : memref<32x96xf32, #tpu.memory_space<vmem>>, vector<32x96xf32>
    %c0_2 = arith.constant 0 : index
    %c0_3 = arith.constant 0 : index
    %4 = vector.load %arg3[%c0_2, %c0_3] : memref<32x96xf32, #tpu.memory_space<vmem>>, vector<32x96xf32>
    %c0_4 = arith.constant 0 : index
    %c0_5 = arith.constant 0 : index
    %5 = vector.load %arg4[%c0_4, %c0_5] : memref<1x96xf32, #tpu.memory_space<vmem>>, vector<1x64xf32>
    %c0_6 = arith.constant 0 : index
    %c0_7 = arith.constant 0 : index
    %6 = vector.load %arg5[%c0_6, %c0_7] : memref<1x96xf32, #tpu.memory_space<vmem>>, vector<1x64xf32>
    %7 = arith.addf %5, %6 : vector<1x64xf32>
    %c0_8 = arith.constant 0 : index
    %c64 = arith.constant 64 : index
    %8 = vector.load %arg4[%c0_8, %c64] : memref<1x96xf32, #tpu.memory_space<vmem>>, vector<1x32xf32>
    %c0_9 = arith.constant 0 : index
    %c64_10 = arith.constant 64 : index
    %9 = vector.load %arg5[%c0_9, %c64_10] : memref<1x96xf32, #tpu.memory_space<vmem>>, vector<1x32xf32>
    %c0_11 = arith.constant 0 : index
    %c0_12 = arith.constant 0 : index
    %10 = vector.load %arg7[%c0_11, %c0_12] : memref<2x32xf32, #tpu.memory_space<vmem>>, vector<2x32xf32>
    %c0_13 = arith.constant 0 : index
    %c0_14 = arith.constant 0 : index
    %c0_15 = arith.constant 0 : index
    %11 = vector.load %arg1[%c0_13, %c0_14, %c0_15] : memref<8x2x32xf32, #tpu.memory_space<vmem>>, vector<1x2x32xf32>
    %12 = vector.shape_cast %11 : vector<1x2x32xf32> to vector<2x32xf32>
    %cst = arith.constant dense<0.000000e+00> : vector<2x96xf32>
    %13 = tpu.matmul %12, %3, %cst {dimension_numbers = #tpu.dot_dimension_numbers<[1], [0], [0], [1], [0, 0, 1, 1], [], []>} : vector<2x32xf32>, vector<32x96xf32>, vector<2x96xf32> -> vector<2x96xf32>
    %cst_16 = arith.constant dense<0.000000e+00> : vector<2x96xf32>
    %14 = tpu.matmul %10, %4, %cst_16 {dimension_numbers = #tpu.dot_dimension_numbers<[1], [0], [0], [1], [0, 0, 1, 1], [], []>} : vector<2x32xf32>, vector<32x96xf32>, vector<2x96xf32> -> vector<2x96xf32>
    %15 = vector.extract_strided_slice %13 {offsets = [0, 0], sizes = [2, 64], strides = [1, 1]} : vector<2x96xf32> to vector<2x64xf32>
    %16 = vector.extract_strided_slice %14 {offsets = [0, 0], sizes = [2, 64], strides = [1, 1]} : vector<2x96xf32> to vector<2x64xf32>
    %17 = arith.addf %15, %16 : vector<2x64xf32>
    %18 = vector.broadcast %7 : vector<1x64xf32> to vector<2x64xf32>
    %19 = arith.addf %17, %18 : vector<2x64xf32>
    %20 = arith.negf %19 : vector<2x64xf32>
    %21 = math.exp %20 : vector<2x64xf32>
    %cst_17 = arith.constant 1.000000e+00 : f32
    %22 = vector.broadcast %cst_17 : f32 to vector<2x64xf32>
    %23 = arith.addf %22, %21 : vector<2x64xf32>
    %24 = arith.divf %22, %23 : vector<2x64xf32>
    %25 = vector.extract_strided_slice %24 {offsets = [0, 0], sizes = [2, 32], strides = [1, 1]} : vector<2x64xf32> to vector<2x32xf32>
    %26 = vector.extract_strided_slice %24 {offsets = [0, 32], sizes = [2, 32], strides = [1, 1]} : vector<2x64xf32> to vector<2x32xf32>
    %27 = vector.extract_strided_slice %13 {offsets = [0, 64], sizes = [2, 32], strides = [1, 1]} : vector<2x96xf32> to vector<2x32xf32>
    %28 = vector.broadcast %8 : vector<1x32xf32> to vector<2x32xf32>
    %29 = arith.addf %27, %28 : vector<2x32xf32>
    %30 = vector.extract_strided_slice %14 {offsets = [0, 64], sizes = [2, 32], strides = [1, 1]} : vector<2x96xf32> to vector<2x32xf32>
    %31 = vector.broadcast %9 : vector<1x32xf32> to vector<2x32xf32>
    %32 = arith.addf %30, %31 : vector<2x32xf32>
    %33 = arith.mulf %25, %32 : vector<2x32xf32>
    %34 = arith.addf %29, %33 : vector<2x32xf32>
    %35 = math.tanh %34 : vector<2x32xf32>
    %cst_18 = arith.constant 1.000000e+00 : f32
    %36 = vector.broadcast %cst_18 : f32 to vector<2x32xf32>
    %37 = arith.subf %36, %26 : vector<2x32xf32>
    %38 = arith.mulf %37, %35 : vector<2x32xf32>
    %39 = arith.mulf %26, %10 : vector<2x32xf32>
    %40 = arith.addf %38, %39 : vector<2x32xf32>
    %c0_19 = arith.constant 0 : index
    %c0_20 = arith.constant 0 : index
    %c0_21 = arith.constant 0 : index
    %41 = vector.load %arg6[%c0_19, %c0_20, %c0_21] : memref<8x2x32xf32, #tpu.memory_space<vmem>>, vector<1x2x32xf32>
    %42 = vector.shape_cast %41 : vector<1x2x32xf32> to vector<2x32xf32>
    %43 = vector.shape_cast %40 : vector<2x32xf32> to vector<1x2x32xf32>
    tpu.vector_store %arg6[%c0_19, %c0_20, %c0_21], %43 {strides = array<i32>} : memref<8x2x32xf32, #tpu.memory_space<vmem>>, vector<1x2x32xf32>,
    %c1 = arith.constant 1 : index
    %c0_22 = arith.constant 0 : index
    %c0_23 = arith.constant 0 : index
    %44 = vector.load %arg1[%c1, %c0_22, %c0_23] : memref<8x2x32xf32, #tpu.memory_space<vmem>>, vector<1x2x32xf32>
    %45 = vector.shape_cast %44 : vector<1x2x32xf32> to vector<2x32xf32>
    %cst_24 = arith.constant dense<0.000000e+00> : vector<2x96xf32>
    %46 = tpu.matmul %45, %3, %cst_24 {dimension_numbers = #tpu.dot_dimension_numbers<[1], [0], [0], [1], [0, 0, 1, 1], [], []>} : vector<2x32xf32>, vector<32x96xf32>, vector<2x96xf32> -> vector<2x96xf32>
    %cst_25 = arith.constant dense<0.000000e+00> : vector<2x96xf32>
    %47 = tpu.matmul %40, %4, %cst_25 {dimension_numbers = #tpu.dot_dimension_numbers<[1], [0], [0], [1], [0, 0, 1, 1], [], []>} : vector<2x32xf32>, vector<32x96xf32>, vector<2x96xf32> -> vector<2x96xf32>
    %48 = vector.extract_strided_slice %46 {offsets = [0, 0], sizes = [2, 64], strides = [1, 1]} : vector<2x96xf32> to vector<2x64xf32>
    %49 = vector.extract_strided_slice %47 {offsets = [0, 0], sizes = [2, 64], strides = [1, 1]} : vector<2x96xf32> to vector<2x64xf32>
    %50 = arith.addf %48, %49 : vector<2x64xf32>
    %51 = vector.broadcast %7 : vector<1x64xf32> to vector<2x64xf32>
    %52 = arith.addf %50, %51 : vector<2x64xf32>
    %53 = arith.negf %52 : vector<2x64xf32>
    %54 = math.exp %53 : vector<2x64xf32>
    %cst_26 = arith.constant 1.000000e+00 : f32
    %55 = vector.broadcast %cst_26 : f32 to vector<2x64xf32>
    %56 = arith.addf %55, %54 : vector<2x64xf32>
    %57 = arith.divf %55, %56 : vector<2x64xf32>
    %58 = vector.extract_strided_slice %57 {offsets = [0, 0], sizes = [2, 32], strides = [1, 1]} : vector<2x64xf32> to vector<2x32xf32>
    %59 = vector.extract_strided_slice %57 {offsets = [0, 32], sizes = [2, 32], strides = [1, 1]} : vector<2x64xf32> to vector<2x32xf32>
    %60 = vector.extract_strided_slice %46 {offsets = [0, 64], sizes = [2, 32], strides = [1, 1]} : vector<2x96xf32> to vector<2x32xf32>
    %61 = vector.broadcast %8 : vector<1x32xf32> to vector<2x32xf32>
    %62 = arith.addf %60, %61 : vector<2x32xf32>
    %63 = vector.extract_strided_slice %47 {offsets = [0, 64], sizes = [2, 32], strides = [1, 1]} : vector<2x96xf32> to vector<2x32xf32>
    %64 = vector.broadcast %9 : vector<1x32xf32> to vector<2x32xf32>
    %65 = arith.addf %63, %64 : vector<2x32xf32>
    %66 = arith.mulf %58, %65 : vector<2x32xf32>
    %67 = arith.addf %62, %66 : vector<2x32xf32>
    %68 = math.tanh %67 : vector<2x32xf32>
    %cst_27 = arith.constant 1.000000e+00 : f32
    %69 = vector.broadcast %cst_27 : f32 to vector<2x32xf32>
    %70 = arith.subf %69, %59 : vector<2x32xf32>
    %71 = arith.mulf %70, %68 : vector<2x32xf32>
    %72 = arith.mulf %59, %40 : vector<2x32xf32>
    %73 = arith.addf %71, %72 : vector<2x32xf32>
    %c1_28 = arith.constant 1 : index
    %c0_29 = arith.constant 0 : index
    %c0_30 = arith.constant 0 : index
    %74 = vector.load %arg6[%c1_28, %c0_29, %c0_30] : memref<8x2x32xf32, #tpu.memory_space<vmem>>, vector<1x2x32xf32>
    %75 = vector.shape_cast %74 : vector<1x2x32xf32> to vector<2x32xf32>
    %76 = vector.shape_cast %73 : vector<2x32xf32> to vector<1x2x32xf32>
    tpu.vector_store %arg6[%c1_28, %c0_29, %c0_30], %76 {strides = array<i32>} : memref<8x2x32xf32, #tpu.memory_space<vmem>>, vector<1x2x32xf32>,
    %c2 = arith.constant 2 : index
    %c0_31 = arith.constant 0 : index
    %c0_32 = arith.constant 0 : index
    %77 = vector.load %arg1[%c2, %c0_31, %c0_32] : memref<8x2x32xf32, #tpu.memory_space<vmem>>, vector<1x2x32xf32>
    %78 = vector.shape_cast %77 : vector<1x2x32xf32> to vector<2x32xf32>
    %cst_33 = arith.constant dense<0.000000e+00> : vector<2x96xf32>
    %79 = tpu.matmul %78, %3, %cst_33 {dimension_numbers = #tpu.dot_dimension_numbers<[1], [0], [0], [1], [0, 0, 1, 1], [], []>} : vector<2x32xf32>, vector<32x96xf32>, vector<2x96xf32> -> vector<2x96xf32>
    %cst_34 = arith.constant dense<0.000000e+00> : vector<2x96xf32>
    %80 = tpu.matmul %73, %4, %cst_34 {dimension_numbers = #tpu.dot_dimension_numbers<[1], [0], [0], [1], [0, 0, 1, 1], [], []>} : vector<2x32xf32>, vector<32x96xf32>, vector<2x96xf32> -> vector<2x96xf32>
    %81 = vector.extract_strided_slice %79 {offsets = [0, 0], sizes = [2, 64], strides = [1, 1]} : vector<2x96xf32> to vector<2x64xf32>
    %82 = vector.extract_strided_slice %80 {offsets = [0, 0], sizes = [2, 64], strides = [1, 1]} : vector<2x96xf32> to vector<2x64xf32>
    %83 = arith.addf %81, %82 : vector<2x64xf32>
    %84 = vector.broadcast %7 : vector<1x64xf32> to vector<2x64xf32>
    %85 = arith.addf %83, %84 : vector<2x64xf32>
    %86 = arith.negf %85 : vector<2x64xf32>
    %87 = math.exp %86 : vector<2x64xf32>
    %cst_35 = arith.constant 1.000000e+00 : f32
    %88 = vector.broadcast %cst_35 : f32 to vector<2x64xf32>
    %89 = arith.addf %88, %87 : vector<2x64xf32>
    %90 = arith.divf %88, %89 : vector<2x64xf32>
    %91 = vector.extract_strided_slice %90 {offsets = [0, 0], sizes = [2, 32], strides = [1, 1]} : vector<2x64xf32> to vector<2x32xf32>
    %92 = vector.extract_strided_slice %90 {offsets = [0, 32], sizes = [2, 32], strides = [1, 1]} : vector<2x64xf32> to vector<2x32xf32>
    %93 = vector.extract_strided_slice %79 {offsets = [0, 64], sizes = [2, 32], strides = [1, 1]} : vector<2x96xf32> to vector<2x32xf32>
    %94 = vector.broadcast %8 : vector<1x32xf32> to vector<2x32xf32>
    %95 = arith.addf %93, %94 : vector<2x32xf32>
    %96 = vector.extract_strided_slice %80 {offsets = [0, 64], sizes = [2, 32], strides = [1, 1]} : vector<2x96xf32> to vector<2x32xf32>
    %97 = vector.broadcast %9 : vector<1x32xf32> to vector<2x32xf32>
    %98 = arith.addf %96, %97 : vector<2x32xf32>
    %99 = arith.mulf %91, %98 : vector<2x32xf32>
    %100 = arith.addf %95, %99 : vector<2x32xf32>
    %101 = math.tanh %100 : vector<2x32xf32>
    %cst_36 = arith.constant 1.000000e+00 : f32
    %102 = vector.broadcast %cst_36 : f32 to vector<2x32xf32>
    %103 = arith.subf %102, %92 : vector<2x32xf32>
    %104 = arith.mulf %103, %101 : vector<2x32xf32>
    %105 = arith.mulf %92, %73 : vector<2x32xf32>
    %106 = arith.addf %104, %105 : vector<2x32xf32>
    %c2_37 = arith.constant 2 : index
    %c0_38 = arith.constant 0 : index
    %c0_39 = arith.constant 0 : index
    %107 = vector.load %arg6[%c2_37, %c0_38, %c0_39] : memref<8x2x32xf32, #tpu.memory_space<vmem>>, vector<1x2x32xf32>
    %108 = vector.shape_cast %107 : vector<1x2x32xf32> to vector<2x32xf32>
    %109 = vector.shape_cast %106 : vector<2x32xf32> to vector<1x2x32xf32>
    tpu.vector_store %arg6[%c2_37, %c0_38, %c0_39], %109 {strides = array<i32>} : memref<8x2x32xf32, #tpu.memory_space<vmem>>, vector<1x2x32xf32>,
    %c3 = arith.constant 3 : index
    %c0_40 = arith.constant 0 : index
    %c0_41 = arith.constant 0 : index
    %110 = vector.load %arg1[%c3, %c0_40, %c0_41] : memref<8x2x32xf32, #tpu.memory_space<vmem>>, vector<1x2x32xf32>
    %111 = vector.shape_cast %110 : vector<1x2x32xf32> to vector<2x32xf32>
    %cst_42 = arith.constant dense<0.000000e+00> : vector<2x96xf32>
    %112 = tpu.matmul %111, %3, %cst_42 {dimension_numbers = #tpu.dot_dimension_numbers<[1], [0], [0], [1], [0, 0, 1, 1], [], []>} : vector<2x32xf32>, vector<32x96xf32>, vector<2x96xf32> -> vector<2x96xf32>
    %cst_43 = arith.constant dense<0.000000e+00> : vector<2x96xf32>
    %113 = tpu.matmul %106, %4, %cst_43 {dimension_numbers = #tpu.dot_dimension_numbers<[1], [0], [0], [1], [0, 0, 1, 1], [], []>} : vector<2x32xf32>, vector<32x96xf32>, vector<2x96xf32> -> vector<2x96xf32>
    %114 = vector.extract_strided_slice %112 {offsets = [0, 0], sizes = [2, 64], strides = [1, 1]} : vector<2x96xf32> to vector<2x64xf32>
    %115 = vector.extract_strided_slice %113 {offsets = [0, 0], sizes = [2, 64], strides = [1, 1]} : vector<2x96xf32> to vector<2x64xf32>
    %116 = arith.addf %114, %115 : vector<2x64xf32>
    %117 = vector.broadcast %7 : vector<1x64xf32> to vector<2x64xf32>
    %118 = arith.addf %116, %117 : vector<2x64xf32>
    %119 = arith.negf %118 : vector<2x64xf32>
    %120 = math.exp %119 : vector<2x64xf32>
    %cst_44 = arith.constant 1.000000e+00 : f32
    %121 = vector.broadcast %cst_44 : f32 to vector<2x64xf32>
    %122 = arith.addf %121, %120 : vector<2x64xf32>
    %123 = arith.divf %121, %122 : vector<2x64xf32>
    %124 = vector.extract_strided_slice %123 {offsets = [0, 0], sizes = [2, 32], strides = [1, 1]} : vector<2x64xf32> to vector<2x32xf32>
    %125 = vector.extract_strided_slice %123 {offsets = [0, 32], sizes = [2, 32], strides = [1, 1]} : vector<2x64xf32> to vector<2x32xf32>
    %126 = vector.extract_strided_slice %112 {offsets = [0, 64], sizes = [2, 32], strides = [1, 1]} : vector<2x96xf32> to vector<2x32xf32>
    %127 = vector.broadcast %8 : vector<1x32xf32> to vector<2x32xf32>
    %128 = arith.addf %126, %127 : vector<2x32xf32>
    %129 = vector.extract_strided_slice %113 {offsets = [0, 64], sizes = [2, 32], strides = [1, 1]} : vector<2x96xf32> to vector<2x32xf32>
    %130 = vector.broadcast %9 : vector<1x32xf32> to vector<2x32xf32>
    %131 = arith.addf %129, %130 : vector<2x32xf32>
    %132 = arith.mulf %124, %131 : vector<2x32xf32>
    %133 = arith.addf %128, %132 : vector<2x32xf32>
    %134 = math.tanh %133 : vector<2x32xf32>
    %cst_45 = arith.constant 1.000000e+00 : f32
    %135 = vector.broadcast %cst_45 : f32 to vector<2x32xf32>
    %136 = arith.subf %135, %125 : vector<2x32xf32>
    %137 = arith.mulf %136, %134 : vector<2x32xf32>
    %138 = arith.mulf %125, %106 : vector<2x32xf32>
    %139 = arith.addf %137, %138 : vector<2x32xf32>
    %c3_46 = arith.constant 3 : index
    %c0_47 = arith.constant 0 : index
    %c0_48 = arith.constant 0 : index
    %140 = vector.load %arg6[%c3_46, %c0_47, %c0_48] : memref<8x2x32xf32, #tpu.memory_space<vmem>>, vector<1x2x32xf32>
    %141 = vector.shape_cast %140 : vector<1x2x32xf32> to vector<2x32xf32>
    %142 = vector.shape_cast %139 : vector<2x32xf32> to vector<1x2x32xf32>
    tpu.vector_store %arg6[%c3_46, %c0_47, %c0_48], %142 {strides = array<i32>} : memref<8x2x32xf32, #tpu.memory_space<vmem>>, vector<1x2x32xf32>,
    %c4 = arith.constant 4 : index
    %c0_49 = arith.constant 0 : index
    %c0_50 = arith.constant 0 : index
    %143 = vector.load %arg1[%c4, %c0_49, %c0_50] : memref<8x2x32xf32, #tpu.memory_space<vmem>>, vector<1x2x32xf32>
    %144 = vector.shape_cast %143 : vector<1x2x32xf32> to vector<2x32xf32>
    %cst_51 = arith.constant dense<0.000000e+00> : vector<2x96xf32>
    %145 = tpu.matmul %144, %3, %cst_51 {dimension_numbers = #tpu.dot_dimension_numbers<[1], [0], [0], [1], [0, 0, 1, 1], [], []>} : vector<2x32xf32>, vector<32x96xf32>, vector<2x96xf32> -> vector<2x96xf32>
    %cst_52 = arith.constant dense<0.000000e+00> : vector<2x96xf32>
    %146 = tpu.matmul %139, %4, %cst_52 {dimension_numbers = #tpu.dot_dimension_numbers<[1], [0], [0], [1], [0, 0, 1, 1], [], []>} : vector<2x32xf32>, vector<32x96xf32>, vector<2x96xf32> -> vector<2x96xf32>
    %147 = vector.extract_strided_slice %145 {offsets = [0, 0], sizes = [2, 64], strides = [1, 1]} : vector<2x96xf32> to vector<2x64xf32>
    %148 = vector.extract_strided_slice %146 {offsets = [0, 0], sizes = [2, 64], strides = [1, 1]} : vector<2x96xf32> to vector<2x64xf32>
    %149 = arith.addf %147, %148 : vector<2x64xf32>
    %150 = vector.broadcast %7 : vector<1x64xf32> to vector<2x64xf32>
    %151 = arith.addf %149, %150 : vector<2x64xf32>
    %152 = arith.negf %151 : vector<2x64xf32>
    %153 = math.exp %152 : vector<2x64xf32>
    %cst_53 = arith.constant 1.000000e+00 : f32
    %154 = vector.broadcast %cst_53 : f32 to vector<2x64xf32>
    %155 = arith.addf %154, %153 : vector<2x64xf32>
    %156 = arith.divf %154, %155 : vector<2x64xf32>
    %157 = vector.extract_strided_slice %156 {offsets = [0, 0], sizes = [2, 32], strides = [1, 1]} : vector<2x64xf32> to vector<2x32xf32>
    %158 = vector.extract_strided_slice %156 {offsets = [0, 32], sizes = [2, 32], strides = [1, 1]} : vector<2x64xf32> to vector<2x32xf32>
    %159 = vector.extract_strided_slice %145 {offsets = [0, 64], sizes = [2, 32], strides = [1, 1]} : vector<2x96xf32> to vector<2x32xf32>
    %160 = vector.broadcast %8 : vector<1x32xf32> to vector<2x32xf32>
    %161 = arith.addf %159, %160 : vector<2x32xf32>
    %162 = vector.extract_strided_slice %146 {offsets = [0, 64], sizes = [2, 32], strides = [1, 1]} : vector<2x96xf32> to vector<2x32xf32>
    %163 = vector.broadcast %9 : vector<1x32xf32> to vector<2x32xf32>
    %164 = arith.addf %162, %163 : vector<2x32xf32>
    %165 = arith.mulf %157, %164 : vector<2x32xf32>
    %166 = arith.addf %161, %165 : vector<2x32xf32>
    %167 = math.tanh %166 : vector<2x32xf32>
    %cst_54 = arith.constant 1.000000e+00 : f32
    %168 = vector.broadcast %cst_54 : f32 to vector<2x32xf32>
    %169 = arith.subf %168, %158 : vector<2x32xf32>
    %170 = arith.mulf %169, %167 : vector<2x32xf32>
    %171 = arith.mulf %158, %139 : vector<2x32xf32>
    %172 = arith.addf %170, %171 : vector<2x32xf32>
    %c4_55 = arith.constant 4 : index
    %c0_56 = arith.constant 0 : index
    %c0_57 = arith.constant 0 : index
    %173 = vector.load %arg6[%c4_55, %c0_56, %c0_57] : memref<8x2x32xf32, #tpu.memory_space<vmem>>, vector<1x2x32xf32>
    %174 = vector.shape_cast %173 : vector<1x2x32xf32> to vector<2x32xf32>
    %175 = vector.shape_cast %172 : vector<2x32xf32> to vector<1x2x32xf32>
    tpu.vector_store %arg6[%c4_55, %c0_56, %c0_57], %175 {strides = array<i32>} : memref<8x2x32xf32, #tpu.memory_space<vmem>>, vector<1x2x32xf32>,
    %c5 = arith.constant 5 : index
    %c0_58 = arith.constant 0 : index
    %c0_59 = arith.constant 0 : index
    %176 = vector.load %arg1[%c5, %c0_58, %c0_59] : memref<8x2x32xf32, #tpu.memory_space<vmem>>, vector<1x2x32xf32>
    %177 = vector.shape_cast %176 : vector<1x2x32xf32> to vector<2x32xf32>
    %cst_60 = arith.constant dense<0.000000e+00> : vector<2x96xf32>
    %178 = tpu.matmul %177, %3, %cst_60 {dimension_numbers = #tpu.dot_dimension_numbers<[1], [0], [0], [1], [0, 0, 1, 1], [], []>} : vector<2x32xf32>, vector<32x96xf32>, vector<2x96xf32> -> vector<2x96xf32>
    %cst_61 = arith.constant dense<0.000000e+00> : vector<2x96xf32>
    %179 = tpu.matmul %172, %4, %cst_61 {dimension_numbers = #tpu.dot_dimension_numbers<[1], [0], [0], [1], [0, 0, 1, 1], [], []>} : vector<2x32xf32>, vector<32x96xf32>, vector<2x96xf32> -> vector<2x96xf32>
    %180 = vector.extract_strided_slice %178 {offsets = [0, 0], sizes = [2, 64], strides = [1, 1]} : vector<2x96xf32> to vector<2x64xf32>
    %181 = vector.extract_strided_slice %179 {offsets = [0, 0], sizes = [2, 64], strides = [1, 1]} : vector<2x96xf32> to vector<2x64xf32>
    %182 = arith.addf %180, %181 : vector<2x64xf32>
    %183 = vector.broadcast %7 : vector<1x64xf32> to vector<2x64xf32>
    %184 = arith.addf %182, %183 : vector<2x64xf32>
    %185 = arith.negf %184 : vector<2x64xf32>
    %186 = math.exp %185 : vector<2x64xf32>
    %cst_62 = arith.constant 1.000000e+00 : f32
    %187 = vector.broadcast %cst_62 : f32 to vector<2x64xf32>
    %188 = arith.addf %187, %186 : vector<2x64xf32>
    %189 = arith.divf %187, %188 : vector<2x64xf32>
    %190 = vector.extract_strided_slice %189 {offsets = [0, 0], sizes = [2, 32], strides = [1, 1]} : vector<2x64xf32> to vector<2x32xf32>
    %191 = vector.extract_strided_slice %189 {offsets = [0, 32], sizes = [2, 32], strides = [1, 1]} : vector<2x64xf32> to vector<2x32xf32>
    %192 = vector.extract_strided_slice %178 {offsets = [0, 64], sizes = [2, 32], strides = [1, 1]} : vector<2x96xf32> to vector<2x32xf32>
    %193 = vector.broadcast %8 : vector<1x32xf32> to vector<2x32xf32>
    %194 = arith.addf %192, %193 : vector<2x32xf32>
    %195 = vector.extract_strided_slice %179 {offsets = [0, 64], sizes = [2, 32], strides = [1, 1]} : vector<2x96xf32> to vector<2x32xf32>
    %196 = vector.broadcast %9 : vector<1x32xf32> to vector<2x32xf32>
    %197 = arith.addf %195, %196 : vector<2x32xf32>
    %198 = arith.mulf %190, %197 : vector<2x32xf32>
    %199 = arith.addf %194, %198 : vector<2x32xf32>
    %200 = math.tanh %199 : vector<2x32xf32>
    %cst_63 = arith.constant 1.000000e+00 : f32
    %201 = vector.broadcast %cst_63 : f32 to vector<2x32xf32>
    %202 = arith.subf %201, %191 : vector<2x32xf32>
    %203 = arith.mulf %202, %200 : vector<2x32xf32>
    %204 = arith.mulf %191, %172 : vector<2x32xf32>
    %205 = arith.addf %203, %204 : vector<2x32xf32>
    %c5_64 = arith.constant 5 : index
    %c0_65 = arith.constant 0 : index
    %c0_66 = arith.constant 0 : index
    %206 = vector.load %arg6[%c5_64, %c0_65, %c0_66] : memref<8x2x32xf32, #tpu.memory_space<vmem>>, vector<1x2x32xf32>
    %207 = vector.shape_cast %206 : vector<1x2x32xf32> to vector<2x32xf32>
    %208 = vector.shape_cast %205 : vector<2x32xf32> to vector<1x2x32xf32>
    tpu.vector_store %arg6[%c5_64, %c0_65, %c0_66], %208 {strides = array<i32>} : memref<8x2x32xf32, #tpu.memory_space<vmem>>, vector<1x2x32xf32>,
    %c6 = arith.constant 6 : index
    %c0_67 = arith.constant 0 : index
    %c0_68 = arith.constant 0 : index
    %209 = vector.load %arg1[%c6, %c0_67, %c0_68] : memref<8x2x32xf32, #tpu.memory_space<vmem>>, vector<1x2x32xf32>
    %210 = vector.shape_cast %209 : vector<1x2x32xf32> to vector<2x32xf32>
    %cst_69 = arith.constant dense<0.000000e+00> : vector<2x96xf32>
    %211 = tpu.matmul %210, %3, %cst_69 {dimension_numbers = #tpu.dot_dimension_numbers<[1], [0], [0], [1], [0, 0, 1, 1], [], []>} : vector<2x32xf32>, vector<32x96xf32>, vector<2x96xf32> -> vector<2x96xf32>
    %cst_70 = arith.constant dense<0.000000e+00> : vector<2x96xf32>
    %212 = tpu.matmul %205, %4, %cst_70 {dimension_numbers = #tpu.dot_dimension_numbers<[1], [0], [0], [1], [0, 0, 1, 1], [], []>} : vector<2x32xf32>, vector<32x96xf32>, vector<2x96xf32> -> vector<2x96xf32>
    %213 = vector.extract_strided_slice %211 {offsets = [0, 0], sizes = [2, 64], strides = [1, 1]} : vector<2x96xf32> to vector<2x64xf32>
    %214 = vector.extract_strided_slice %212 {offsets = [0, 0], sizes = [2, 64], strides = [1, 1]} : vector<2x96xf32> to vector<2x64xf32>
    %215 = arith.addf %213, %214 : vector<2x64xf32>
    %216 = vector.broadcast %7 : vector<1x64xf32> to vector<2x64xf32>
    %217 = arith.addf %215, %216 : vector<2x64xf32>
    %218 = arith.negf %217 : vector<2x64xf32>
    %219 = math.exp %218 : vector<2x64xf32>
    %cst_71 = arith.constant 1.000000e+00 : f32
    %220 = vector.broadcast %cst_71 : f32 to vector<2x64xf32>
    %221 = arith.addf %220, %219 : vector<2x64xf32>
    %222 = arith.divf %220, %221 : vector<2x64xf32>
    %223 = vector.extract_strided_slice %222 {offsets = [0, 0], sizes = [2, 32], strides = [1, 1]} : vector<2x64xf32> to vector<2x32xf32>
    %224 = vector.extract_strided_slice %222 {offsets = [0, 32], sizes = [2, 32], strides = [1, 1]} : vector<2x64xf32> to vector<2x32xf32>
    %225 = vector.extract_strided_slice %211 {offsets = [0, 64], sizes = [2, 32], strides = [1, 1]} : vector<2x96xf32> to vector<2x32xf32>
    %226 = vector.broadcast %8 : vector<1x32xf32> to vector<2x32xf32>
    %227 = arith.addf %225, %226 : vector<2x32xf32>
    %228 = vector.extract_strided_slice %212 {offsets = [0, 64], sizes = [2, 32], strides = [1, 1]} : vector<2x96xf32> to vector<2x32xf32>
    %229 = vector.broadcast %9 : vector<1x32xf32> to vector<2x32xf32>
    %230 = arith.addf %228, %229 : vector<2x32xf32>
    %231 = arith.mulf %223, %230 : vector<2x32xf32>
    %232 = arith.addf %227, %231 : vector<2x32xf32>
    %233 = math.tanh %232 : vector<2x32xf32>
    %cst_72 = arith.constant 1.000000e+00 : f32
    %234 = vector.broadcast %cst_72 : f32 to vector<2x32xf32>
    %235 = arith.subf %234, %224 : vector<2x32xf32>
    %236 = arith.mulf %235, %233 : vector<2x32xf32>
    %237 = arith.mulf %224, %205 : vector<2x32xf32>
    %238 = arith.addf %236, %237 : vector<2x32xf32>
    %c6_73 = arith.constant 6 : index
    %c0_74 = arith.constant 0 : index
    %c0_75 = arith.constant 0 : index
    %239 = vector.load %arg6[%c6_73, %c0_74, %c0_75] : memref<8x2x32xf32, #tpu.memory_space<vmem>>, vector<1x2x32xf32>
    %240 = vector.shape_cast %239 : vector<1x2x32xf32> to vector<2x32xf32>
    %241 = vector.shape_cast %238 : vector<2x32xf32> to vector<1x2x32xf32>
    tpu.vector_store %arg6[%c6_73, %c0_74, %c0_75], %241 {strides = array<i32>} : memref<8x2x32xf32, #tpu.memory_space<vmem>>, vector<1x2x32xf32>,
    %c7 = arith.constant 7 : index
    %c0_76 = arith.constant 0 : index
    %c0_77 = arith.constant 0 : index
    %242 = vector.load %arg1[%c7, %c0_76, %c0_77] : memref<8x2x32xf32, #tpu.memory_space<vmem>>, vector<1x2x32xf32>
    %243 = vector.shape_cast %242 : vector<1x2x32xf32> to vector<2x32xf32>
    %cst_78 = arith.constant dense<0.000000e+00> : vector<2x96xf32>
    %244 = tpu.matmul %243, %3, %cst_78 {dimension_numbers = #tpu.dot_dimension_numbers<[1], [0], [0], [1], [0, 0, 1, 1], [], []>} : vector<2x32xf32>, vector<32x96xf32>, vector<2x96xf32> -> vector<2x96xf32>
    %cst_79 = arith.constant dense<0.000000e+00> : vector<2x96xf32>
    %245 = tpu.matmul %238, %4, %cst_79 {dimension_numbers = #tpu.dot_dimension_numbers<[1], [0], [0], [1], [0, 0, 1, 1], [], []>} : vector<2x32xf32>, vector<32x96xf32>, vector<2x96xf32> -> vector<2x96xf32>
    %246 = vector.extract_strided_slice %244 {offsets = [0, 0], sizes = [2, 64], strides = [1, 1]} : vector<2x96xf32> to vector<2x64xf32>
    %247 = vector.extract_strided_slice %245 {offsets = [0, 0], sizes = [2, 64], strides = [1, 1]} : vector<2x96xf32> to vector<2x64xf32>
    %248 = arith.addf %246, %247 : vector<2x64xf32>
    %249 = vector.broadcast %7 : vector<1x64xf32> to vector<2x64xf32>
    %250 = arith.addf %248, %249 : vector<2x64xf32>
    %251 = arith.negf %250 : vector<2x64xf32>
    %252 = math.exp %251 : vector<2x64xf32>
    %cst_80 = arith.constant 1.000000e+00 : f32
    %253 = vector.broadcast %cst_80 : f32 to vector<2x64xf32>
    %254 = arith.addf %253, %252 : vector<2x64xf32>
    %255 = arith.divf %253, %254 : vector<2x64xf32>
    %256 = vector.extract_strided_slice %255 {offsets = [0, 0], sizes = [2, 32], strides = [1, 1]} : vector<2x64xf32> to vector<2x32xf32>
    %257 = vector.extract_strided_slice %255 {offsets = [0, 32], sizes = [2, 32], strides = [1, 1]} : vector<2x64xf32> to vector<2x32xf32>
    %258 = vector.extract_strided_slice %244 {offsets = [0, 64], sizes = [2, 32], strides = [1, 1]} : vector<2x96xf32> to vector<2x32xf32>
    %259 = vector.broadcast %8 : vector<1x32xf32> to vector<2x32xf32>
    %260 = arith.addf %258, %259 : vector<2x32xf32>
    %261 = vector.extract_strided_slice %245 {offsets = [0, 64], sizes = [2, 32], strides = [1, 1]} : vector<2x96xf32> to vector<2x32xf32>
    %262 = vector.broadcast %9 : vector<1x32xf32> to vector<2x32xf32>
    %263 = arith.addf %261, %262 : vector<2x32xf32>
    %264 = arith.mulf %256, %263 : vector<2x32xf32>
    %265 = arith.addf %260, %264 : vector<2x32xf32>
    %266 = math.tanh %265 : vector<2x32xf32>
    %cst_81 = arith.constant 1.000000e+00 : f32
    %267 = vector.broadcast %cst_81 : f32 to vector<2x32xf32>
    %268 = arith.subf %267, %257 : vector<2x32xf32>
    %269 = arith.mulf %268, %266 : vector<2x32xf32>
    %270 = arith.mulf %257, %238 : vector<2x32xf32>
    %271 = arith.addf %269, %270 : vector<2x32xf32>
    %c7_82 = arith.constant 7 : index
    %c0_83 = arith.constant 0 : index
    %c0_84 = arith.constant 0 : index
    %272 = vector.load %arg6[%c7_82, %c0_83, %c0_84] : memref<8x2x32xf32, #tpu.memory_space<vmem>>, vector<1x2x32xf32>
    %273 = vector.shape_cast %272 : vector<1x2x32xf32> to vector<2x32xf32>
    %274 = vector.shape_cast %271 : vector<2x32xf32> to vector<1x2x32xf32>
    tpu.vector_store %arg6[%c7_82, %c0_83, %c0_84], %274 {strides = array<i32>} : memref<8x2x32xf32, #tpu.memory_space<vmem>>, vector<1x2x32xf32>,
    %c0_85 = arith.constant 0 : index
    %c0_86 = arith.constant 0 : index
    %275 = vector.load %arg7[%c0_85, %c0_86] : memref<2x32xf32, #tpu.memory_space<vmem>>, vector<2x32xf32>
    tpu.vector_store %arg7[%c0_85, %c0_86], %271 {strides = array<i32>} : memref<2x32xf32, #tpu.memory_space<vmem>>, vector<2x32xf32>,
    return
  }
  func.func @transform_0(%arg0: i32) -> (i32, i32, i32) {
    %c0_i32 = arith.constant 0 : i32
    %c0_i32_0 = arith.constant 0 : i32
    %c0_i32_1 = arith.constant 0 : i32
    return %arg0, %c0_i32, %c0_i32_0 : i32, i32, i32
  }
  func.func @transform_1(%arg0: i32) -> (i32, i32) {
    %c0_i32 = arith.constant 0 : i32
    %c0_i32_0 = arith.constant 0 : i32
    %c0_i32_1 = arith.constant 0 : i32
    return %c0_i32, %c0_i32_0 : i32, i32
  }
  func.func @transform_2(%arg0: i32) -> (i32, i32) {
    %c0_i32 = arith.constant 0 : i32
    %c0_i32_0 = arith.constant 0 : i32
    %c0_i32_1 = arith.constant 0 : i32
    return %c0_i32, %c0_i32_0 : i32, i32
  }
  func.func @transform_3(%arg0: i32) -> (i32, i32) {
    %c0_i32 = arith.constant 0 : i32
    %c0_i32_0 = arith.constant 0 : i32
    %c0_i32_1 = arith.constant 0 : i32
    return %c0_i32, %c0_i32_0 : i32, i32
  }
  func.func @transform_4(%arg0: i32) -> (i32, i32) {
    %c0_i32 = arith.constant 0 : i32
    %c0_i32_0 = arith.constant 0 : i32
    %c0_i32_1 = arith.constant 0 : i32
    return %c0_i32, %c0_i32_0 : i32, i32
  }
  func.func @transform_5(%arg0: i32) -> (i32, i32, i32) {
    %c0_i32 = arith.constant 0 : i32
    %c0_i32_0 = arith.constant 0 : i32
    %c0_i32_1 = arith.constant 0 : i32
    return %arg0, %c0_i32, %c0_i32_0 : i32, i32, i32
  }
}

</mosaic_0001>

<bundles_post_ra>
// kernel: tpu_custom_call.1
= control target key start
LH: loop header
LB: loop body
LE: loop exit
PB: predicated region body
PF: predicated region fallthrough
CT: control target
= control target key end

     0   :  { %10 = vsyncpa [#allocation4], 0  ;;  %s1311_s0 = inlined_call_operand.hbm [shape: f32[8,2,32], index: 0, kind: input, shape index: {}]   ;;  %s1312_s1 = inlined_call_operand.hbm [shape: f32[32,96], index: 1, kind: input, shape index: {}]   ;;  %s1313_s2 = inlined_call_operand.hbm [shape: f32[32,96], index: 2, kind: input, shape index: {}]   ;;  %s1314_s3 = inlined_call_operand.vmem [shape: f32[1,96], index: 3, kind: input, shape index: {}]   ;;  %s1315_s4 = inlined_call_operand.vmem [shape: f32[1,96], index: 4, kind: input, shape index: {}]   ;;  %s1316_s5 = inlined_call_operand.hbm [shape: f32[8,2,32], index: 5, kind: output, shape index: {}]  }
   0x1   :  { %11 = vsyncpa [#allocation7], 0  ;;  %s30_s20 = sshll.u32 %s1312_s1, 4  ;;  %s31_s20 = int_to_ptr.hbm [resolvable:$true] %s30_s20 }
   0x2   :  { %12 = vsyncpa [#allocation5], 0  ;;  %s1067_s21 = smov [#allocation6]   ;;  %s17_s25 = sshll.u32 %s1311_s0, 4  ;;  %s18_s25 = int_to_ptr.hbm [resolvable:$true] %s17_s25 }
   0x3   :  { %s32_s22 = sshll.u32 %s1067_s21, 4  ;;  %s1068_s26 = smov 128   ;;  %s33_s22 = int_to_ptr.vmem [resolvable:$true] %s32_s22 }
   0x4   :  { %s1069_s27 = smov 8   ;;  %s1070_s28 = smov [#allocation3]  }
   0x5   :  { %38 = dma.hbm_to_vmem [thread:$0]  %s31_s20, 512, %s33_s22, [#allocation7], %s1068_s26, %s1068_s26, %s1069_s27  }
   0x6   :  { %s19_s29 = sshll.u32 %s1070_s28, 4  ;;  %s1071_s30 = smov 32   ;;  %s20_s29 = int_to_ptr.vmem [resolvable:$true] %s19_s29 }
   0x7   :  { %s1072_s6 = smov 2   ;;  %s43_s8 = sshll.u32 %s1313_s2, 4  ;;  %s44_s8 = int_to_ptr.hbm [resolvable:$true] %s43_s8 }
   0x8   :  { %25 = dma.hbm_to_vmem [thread:$0]  %s18_s25, 256, %s20_s29, [#allocation4], %s1071_s30, %s1071_s30, %s1072_s6  }
   0x9   :  { %s1073_s9 = smov [#allocation8]  }
   0xa   :  { %s45_s0 = sshll.u32 %s1073_s9, 4  ;;  %s46_s0 = int_to_ptr.vmem [resolvable:$true] %s45_s0 }
   0xb   :  { %51 = dma.hbm_to_vmem [thread:$0]  %s44_s8, 512, %s46_s0, [#allocation7], %s1068_s26, %s1068_s26, %s1069_s27  }
   0xc   :  { %1061 = dma.done.wait [#allocation4], 256  }
   0xd   :  { %1062 = vsyncadd [#allocation4], 4294967040 }
   0xe   :  { %1063 = dma.done.wait [#allocation7], 1024  }
   0xf   :  { %1064 = vsyncadd [#allocation7], 4294966272  ;;  %vm72_vm0 = vcmask 254976   ;;  %v1074_v0 = vmov 0.0   ;;  %v1121_v1 = vld [vmem:[#allocation6 + $0x18] sm:$0xff]  ;;  %v1125_v3 = vld [vmem:[#allocation6 + $0x10] sm:$0xff] }
  0x10   :  { %73 = vst.msk [vmem:[#allocation2] sm:$0x3] %vm72_vm0, %v1074_v0  ;;  %v1123_v2 = vld [vmem:[#allocation8 + $0x18] sm:$0xff]  ;;  %103 = vmatpush.msra.mxu0 %v1121_v1  ;;  %v1129_v4 = vld [vmem:[#allocation8 + $0x10] sm:$0xff]  ;;  %v1131_v5 = vld [vmem:[#allocation6 + $0x8] sm:$0xff]  ;;  %211 = vmatpush.msra.mxu2 %v1121_v1  ;;  %vm87_vm1 = vcmask 261120  }
  0x11   :  { %126 = vmatpush.msra.mxu1 %v1123_v2  ;;  %v1133_v6 = vld [vmem:[#allocation8 + $0x8] sm:$0xff]  ;;  %233 = vmatpush.msra.mxu3 %v1123_v2  ;;  %v1139_v7 = vld [vmem:[#allocation6] sm:$0xff]  ;;  %v86_v9 = vld [vmem:[#allocation3] sm:$0x3]  ;;  %s1075_s11 = smov 64   ;;  %s1076_s17 = smov 96  }
  0x12   :  { %104 = vmatpush.msra.mxu0 %v1125_v3  ;;  %v1141_v8 = vld [vmem:[#allocation8] sm:$0xff]  ;;  %212 = vmatpush.msra.mxu2 %v1125_v3  ;;  %v1185_v11 = vld [vmem:[%s1315_s4] ss:$0 sm:$0xff]  ;;  %v195_v47 = vld [vmem:[#allocation3 + $0x2] sm:$0x3]  ;;  %s866_s21 = sshll.u32 %s1316_s5, 4  ;;  %s867_s21 = int_to_ptr.hbm [resolvable:$true] %s866_s21 }
  0x13   :  { %127 = vmatpush.msra.mxu1 %v1129_v4  ;;  %234 = vmatpush.msra.mxu3 %v1129_v4  ;;  %v82_v14 = vld [vmem:[%s1314_s3] sm:$0x1] }
  0x14   :  { %105 = vmatpush.msra.mxu0 %v1131_v5  ;;  %213 = vmatpush.msra.mxu2 %v1131_v5  ;;  %v83_v15 = vld [vmem:[%s1315_s4] sm:$0x1] }
  0x15   :  { %128 = vmatpush.msra.mxu1 %v1133_v6  ;;  %235 = vmatpush.msra.mxu3 %v1133_v6  ;;  %v84_v16 = vadd.f32 %v83_v15, %v82_v14  ;;  %v1202_v36 = vld [vmem:[%s1314_s3] ss:$0 sm:$0xff]  ;;  %s1077_s3 = smov [#allocation9]  }
  0x16   :  { %106 = vmatpush.msra.mxu0 %v1139_v7  ;;  %214 = vmatpush.msra.mxu2 %v1139_v7  ;;  %s864_s18 = sshll.u32 %s1077_s3, 4  ;;  %s865_s18 = int_to_ptr.vmem [resolvable:$true] %s864_s18 }
  0x17   :  { %v1147_v10 = vld [vmem:[#allocation2] sm:$0x3]  ;;  %129 = vmatpush.msra.mxu1 %v1141_v8  ;;  %880 = vmatmul.msk.f32.vlgmr.msra.gmra.mxu0 %vm87_vm1, %v86_v9  ;;  %v1195_v19 = vperm.slane %v84_v16, 0 }
  0x18   :  { %881 = vmatmul.msk.f32.vlgmr.msra.gmra.mxu1 %vm87_vm1, %v1147_v10  ;;  %236 = vmatpush.msra.mxu3 %v1141_v8 }
  0x19   :  { %328 = vmatpush.msrb.mxu1 %v1123_v2  ;;  %306 = vmatpush.msrb.mxu0 %v1121_v1 }
  0x1a   :  { %423 = vmatpush.msrb.mxu3 %v1123_v2  ;;  %401 = vmatpush.msrb.mxu2 %v1121_v1 }
  0x1b   :  { %329 = vmatpush.msrb.mxu1 %v1129_v4  ;;  %307 = vmatpush.msrb.mxu0 %v1125_v3 }
  0x1c   :  { %424 = vmatpush.msrb.mxu3 %v1129_v4  ;;  %402 = vmatpush.msrb.mxu2 %v1125_v3 }
  0x1d   :  { %330 = vmatpush.msrb.mxu1 %v1133_v6  ;;  %308 = vmatpush.msrb.mxu0 %v1131_v5 }
  0x1e   :  { %425 = vmatpush.msrb.mxu3 %v1133_v6  ;;  %403 = vmatpush.msrb.mxu2 %v1131_v5 }
  0x1f   :  { %331 = vmatpush.msrb.mxu1 %v1141_v8  ;;  %309 = vmatpush.msrb.mxu0 %v1139_v7 }
  0x20   :  { %426 = vmatpush.msrb.mxu3 %v1141_v8  ;;  %404 = vmatpush.msrb.mxu2 %v1139_v7 }
  0x21   :  { %518 = vmatpush.msra.mxu1 %v1123_v2  ;;  %496 = vmatpush.msra.mxu0 %v1121_v1 }
  0x22   :  { %883 = vmatmul.msk.f32.vlgmr.msra.gmra.mxu2 %vm87_vm1, %v195_v47 }
  0x23   :  { %519 = vmatpush.msra.mxu1 %v1129_v4  ;;  %497 = vmatpush.msra.mxu0 %v1125_v3 }
  0x24   :  { %591 = vmatpush.msra.mxu2 %v1121_v1 }
  0x25   :  { %520 = vmatpush.msra.mxu1 %v1133_v6  ;;  %498 = vmatpush.msra.mxu0 %v1131_v5 }
  0x26   :  { %592 = vmatpush.msra.mxu2 %v1125_v3 }
  0x27   :  { %521 = vmatpush.msra.mxu1 %v1141_v8  ;;  %499 = vmatpush.msra.mxu0 %v1139_v7 }
  0x28   :  { %593 = vmatpush.msra.mxu2 %v1131_v5 }
  0x2a   :  { %594 = vmatpush.msra.mxu2 %v1139_v7 }
  0x94   :  { %v108_v17 = vpop.f32.mrf.mxu0 }
  0x95   :  { %v131_v12 = vpop.f32.mrf.mxu1  ;;  %v161_v37 = vadd.f32 %v1202_v36, %v108_v17 }
  0x96   :  { %v165_v13 = vadd.f32 %v1185_v11, %v131_v12  ;;  %v134_v18 = vadd.f32 %v131_v12, %v108_v17 }
  0x98   :  { %167 = vrot.lane.b32.xlu0 %v165_v13, %s1075_s11  ;;  %v138_v20 = vadd.f32 %v1195_v19, %v134_v18 }
  0x9a   :  { %v882_v21 = vmul.f32 -1.442695, %v138_v20 }
  0x9c   :  { %917 = vpow2.f32 %v882_v21 }
  0xa2   :  { %v918_v22 = vpop.eup %917 }
  0xa3   :  { %v142_v23 = vadd.f32 1.0, %v918_v22 }
  0xa5   :  { %919 = vrcp.f32 %v142_v23  ;;  %v154_v29 = vand.u32 2147483648, %v142_v23  ;;  %vm148_vm3 = vweird.f32 %v142_v23  ;;  %v152_v30 = vand.u32 2147483647, %v142_v23  ;;  %v216_v51 = vpop.f32.mrf.mxu2 }
  0xa6   :  { %v262_v14 = vadd.f32 %v1202_v36, %v216_v51 }
  0xa7   :  { %v155_v32 = vor.u32 1.1754944e-38, %v154_v29  ;;  %vm153_vm5 = vcmp.eq.f32.partialorder %v152_v30, 8.507059e+37 }
  0xab   :  { %v920_v24 = vpop.eup %919 }
  0xac   :  { %v144_v25 = vmul.f32 %v920_v24, %v142_v23  ;;  %vm149_vm2 = vweird.f32 %v920_v24 }
  0xad   :  { %vm150_vm4 = vmor %vm148_vm3, %vm149_vm2 }
  0xae   :  { %v145_v26 = vsub.f32 1.0, %v144_v25 }
  0xb0   :  { %v146_v27 = vmul.f32 %v920_v24, %v145_v26 }
  0xb2   :  { %v147_v28 = vadd.f32 %v920_v24, %v146_v27 }
  0xb4   :  { %v151_v31 = vsel %vm150_vm4, %v920_v24, %v147_v28  ;;  %v290_v24 = vld [vmem:[#allocation3 + $0x4] sm:$0x3] }
  0xb5   :  { %v156_v34 = vsel %vm153_vm5, %v155_v32, %v151_v31  ;;  %886 = vmatmul.msk.f32.vlgmr.msrb.gmra.mxu0 %vm87_vm1, %v290_v24 }
  0xb6   :  { %v177_v42 = vsub.f32 1.0, %v156_v34  ;;  %686 = vmatpush.msrb.mxu0 %v1121_v1 }
  0xb8   :  { %687 = vmatpush.msrb.mxu0 %v1125_v3 }
  0xba   :  { %688 = vmatpush.msrb.mxu0 %v1131_v5 }
  0xbc   :  { %689 = vmatpush.msrb.mxu0 %v1139_v7 }
 0x10a   :  { %v168_v33 = vpop.permute.xlu0 %167 }
 0x10b   :  { %v170_v35 = vmul.f32 %v168_v33, %v156_v34 }
 0x10d   :  { %172 = vrot.lane.b32.xlu0 %v170_v35, %s1075_s11 }
 0x132   :  { %v311_v28 = vpop.f32.mrf.mxu0 }
 0x133   :  { %v357_v47 = vadd.f32 %v1202_v36, %v311_v28 }
 0x17f   :  { %v173_v38 = vpop.permute.xlu0 %172 }
 0x180   :  { %v175_v39 = vadd.f32 %v173_v38, %v161_v37 }
 0x182   :  { %921 = vtanh.f32 %v175_v39 }
 0x188   :  { %v922_v40 = vpop.eup %921 }
 0x189   :  { %179 = vrot.lane.b32.xlu1 %v922_v40, %s1076_s17 }
 0x191   :  { %183 = vrot.lane.b32.xlu1 %v1147_v10, %s1071_s30 }
 0x1fb   :  { %v180_v41 = vpop.permute.xlu1 %179 }
 0x1fc   :  { %v182_v44 = vmul.f32 %v180_v41, %v177_v42 }
 0x203   :  { %v184_v43 = vpop.permute.xlu1 %183 }
 0x204   :  { %v186_v45 = vmul.f32 %v184_v43, %v156_v34 }
 0x206   :  { %v187_v46 = vadd.f32 %v186_v45, %v182_v44 }
 0x208   :  { %189 = vrot.lane.b32.xlu2 %v187_v46, %s1076_s17 }
 0x262   :  { %v190_v48 = vpop.permute.xlu2 %189 }
 0x263   :  { %193 = vst.msk [vmem:[#allocation9] sm:$0x3] %vm72_vm0, %v190_v48  ;;  %884 = vmatmul.msk.f32.vlgmr.msra.gmra.mxu3 %vm87_vm1, %v190_v48 }
 0x264   :  { %613 = vmatpush.msra.mxu3 %v1123_v2 }
 0x266   :  { %614 = vmatpush.msra.mxu3 %v1129_v4 }
 0x268   :  { %615 = vmatpush.msra.mxu3 %v1133_v6 }
 0x26a   :  { %616 = vmatpush.msra.mxu3 %v1141_v8 }
 0x2e6   :  { %v238_v49 = vpop.f32.mrf.mxu3 }
 0x2e7   :  { %v263_v50 = vadd.f32 %v1185_v11, %v238_v49  ;;  %v241_v52 = vadd.f32 %v238_v49, %v216_v51 }
 0x2e9   :  { %265 = vrot.lane.b32.xlu2 %v263_v50, %s1075_s11  ;;  %v242_v53 = vadd.f32 %v241_v52, %v1195_v19 }
 0x2eb   :  { %v885_v54 = vmul.f32 -1.442695, %v242_v53 }
 0x2ed   :  { %923 = vpow2.f32 %v885_v54 }
 0x2f3   :  { %v924_v55 = vpop.eup %923 }
 0x2f4   :  { %v246_v56 = vadd.f32 1.0, %v924_v55 }
 0x2f6   :  { %925 = vrcp.f32 %v246_v56  ;;  %v258_v62 = vand.u32 2147483648, %v246_v56  ;;  %vm252_vm7 = vweird.f32 %v246_v56  ;;  %v256_v63 = vand.u32 2147483647, %v246_v56 }
 0x2f8   :  { %v259_v9 = vor.u32 1.1754944e-38, %v258_v62  ;;  %vm257_vm9 = vcmp.eq.f32.partialorder %v256_v63, 8.507059e+37 }
 0x2fc   :  { %v926_v57 = vpop.eup %925 }
 0x2fd   :  { %v248_v58 = vmul.f32 %v926_v57, %v246_v56  ;;  %vm253_vm6 = vweird.f32 %v926_v57  ;;  %v385_v56 = vld [vmem:[#allocation3 + $0x6] sm:$0x3] }
 0x2fe   :  { %vm254_vm8 = vmor %vm252_vm7, %vm253_vm6  ;;  %889 = vmatmul.msk.f32.vlgmr.msrb.gmra.mxu2 %vm87_vm1, %v385_v56 }
 0x2ff   :  { %v249_v59 = vsub.f32 1.0, %v248_v58  ;;  %781 = vmatpush.msrb.mxu2 %v1121_v1 }
 0x301   :  { %v250_v60 = vmul.f32 %v926_v57, %v249_v59  ;;  %782 = vmatpush.msrb.mxu2 %v1125_v3 }
 0x303   :  { %v251_v61 = vadd.f32 %v926_v57, %v250_v60  ;;  %783 = vmatpush.msrb.mxu2 %v1131_v5 }
 0x305   :  { %v255_v0 = vsel %vm254_vm8, %v926_v57, %v251_v61  ;;  %784 = vmatpush.msrb.mxu2 %v1139_v7 }
 0x306   :  { %v260_v12 = vsel %vm257_vm9, %v259_v9, %v255_v0 }
 0x307   :  { %v275_v18 = vsub.f32 1.0, %v260_v12  ;;  %v281_v21 = vmul.f32 %v260_v12, %v187_v46 }
 0x343   :  { %v266_v10 = vpop.permute.xlu2 %265 }
 0x344   :  { %v268_v13 = vmul.f32 %v266_v10, %v260_v12 }
 0x346   :  { %270 = vrot.lane.b32.xlu0 %v268_v13, %s1075_s11 }
 0x381   :  { %v406_v5 = vpop.f32.mrf.mxu2 }
 0x3b8   :  { %v271_v15 = vpop.permute.xlu0 %270 }
 0x3b9   :  { %v273_v16 = vadd.f32 %v271_v15, %v262_v14  ;;  %v452_v15 = vadd.f32 %v1202_v36, %v406_v5 }
 0x3bb   :  { %927 = vtanh.f32 %v273_v16 }
 0x3c1   :  { %v928_v17 = vpop.eup %927 }
 0x3c2   :  { %277 = vrot.lane.b32.xlu1 %v928_v17, %s1076_s17 }
 0x434   :  { %v278_v20 = vpop.permute.xlu1 %277 }
 0x435   :  { %v280_v22 = vmul.f32 %v278_v20, %v275_v18 }
 0x437   :  { %v282_v23 = vadd.f32 %v281_v21, %v280_v22 }
 0x439   :  { %284 = vrot.lane.b32.xlu2 %v282_v23, %s1076_s17 }
 0x493   :  { %v285_v25 = vpop.permute.xlu2 %284 }
 0x494   :  { %288 = vst.msk [vmem:[#allocation9 + $0x2] sm:$0x3] %vm72_vm0, %v285_v25  ;;  %887 = vmatmul.msk.f32.vlgmr.msrb.gmra.mxu1 %vm87_vm1, %v285_v25  ;;  %v480_v25 = vld [vmem:[#allocation3 + $0x8] sm:$0x3] }
 0x495   :  { %708 = vmatpush.msrb.mxu1 %v1123_v2  ;;  %892 = vmatmul.msk.f32.vlgmr.msra.gmra.mxu0 %vm87_vm1, %v480_v25 }
 0x497   :  { %709 = vmatpush.msrb.mxu1 %v1129_v4 }
 0x499   :  { %710 = vmatpush.msrb.mxu1 %v1133_v6 }
 0x49b   :  { %711 = vmatpush.msrb.mxu1 %v1141_v8 }
 0x511   :  { %v333_v26 = vpop.f32.mrf.mxu1 }
 0x512   :  { %v358_v27 = vadd.f32 %v1185_v11, %v333_v26  ;;  %v336_v29 = vadd.f32 %v333_v26, %v311_v28 }
 0x514   :  { %360 = vrot.lane.b32.xlu0 %v358_v27, %s1075_s11  ;;  %v337_v30 = vadd.f32 %v336_v29, %v1195_v19  ;;  %v501_v29 = vpop.f32.mrf.mxu0 }
 0x516   :  { %v888_v31 = vmul.f32 -1.442695, %v337_v30 }
 0x518   :  { %929 = vpow2.f32 %v888_v31 }
 0x51e   :  { %v930_v32 = vpop.eup %929 }
 0x51f   :  { %v341_v33 = vadd.f32 1.0, %v930_v32 }
 0x521   :  { %931 = vrcp.f32 %v341_v33  ;;  %v353_v40 = vand.u32 2147483648, %v341_v33  ;;  %vm347_vm11 = vweird.f32 %v341_v33  ;;  %v351_v41 = vand.u32 2147483647, %v341_v33 }
 0x523   :  { %v354_v43 = vor.u32 1.1754944e-38, %v353_v40  ;;  %vm352_vm13 = vcmp.eq.f32.partialorder %v351_v41, 8.507059e+37 }
 0x527   :  { %v932_v34 = vpop.eup %931 }
 0x528   :  { %v343_v35 = vmul.f32 %v932_v34, %v341_v33  ;;  %vm348_vm10 = vweird.f32 %v932_v34 }
 0x529   :  { %vm349_vm12 = vmor %vm347_vm11, %vm348_vm10 }
 0x52a   :  { %v344_v37 = vsub.f32 1.0, %v343_v35 }
 0x52c   :  { %v345_v38 = vmul.f32 %v932_v34, %v344_v37 }
 0x52e   :  { %v346_v39 = vadd.f32 %v932_v34, %v345_v38 }
 0x530   :  { %v350_v42 = vsel %vm349_vm12, %v932_v34, %v346_v39 }
 0x531   :  { %v355_v45 = vsel %vm352_vm13, %v354_v43, %v350_v42 }
 0x532   :  { %v370_v51 = vsub.f32 1.0, %v355_v45  ;;  %v376_v53 = vmul.f32 %v355_v45, %v282_v23 }
 0x586   :  { %v361_v44 = vpop.permute.xlu0 %360 }
 0x587   :  { %v363_v46 = vmul.f32 %v361_v44, %v355_v45 }
 0x589   :  { %365 = vrot.lane.b32.xlu1 %v363_v46, %s1075_s11 }
 0x5fb   :  { %v366_v48 = vpop.permute.xlu1 %365 }
 0x5fc   :  { %v368_v49 = vadd.f32 %v366_v48, %v357_v47  ;;  %v547_v48 = vadd.f32 %v1202_v36, %v501_v29 }
 0x5fe   :  { %933 = vtanh.f32 %v368_v49 }
 0x604   :  { %v934_v50 = vpop.eup %933 }
 0x605   :  { %372 = vrot.lane.b32.xlu2 %v934_v50, %s1076_s17 }
 0x65f   :  { %v373_v52 = vpop.permute.xlu2 %372 }
 0x660   :  { %v375_v54 = vmul.f32 %v373_v52, %v370_v51 }
 0x662   :  { %v377_v55 = vadd.f32 %v376_v53, %v375_v54 }
 0x664   :  { %379 = vrot.lane.b32.xlu0 %v377_v55, %s1076_s17 }
 0x6d6   :  { %v380_v57 = vpop.permute.xlu0 %379 }
 0x6d7   :  { %383 = vst.msk [vmem:[#allocation9 + $0x4] sm:$0x3] %vm72_vm0, %v380_v57  ;;  %890 = vmatmul.msk.f32.vlgmr.msrb.gmra.mxu3 %vm87_vm1, %v380_v57  ;;  %v575_v57 = vld [vmem:[#allocation3 + $0xa] sm:$0x3] }
 0x6d8   :  { %803 = vmatpush.msrb.mxu3 %v1123_v2  ;;  %895 = vmatmul.msk.f32.vlgmr.msra.gmra.mxu2 %vm87_vm1, %v575_v57 }
 0x6da   :  { %804 = vmatpush.msrb.mxu3 %v1129_v4 }
 0x6dc   :  { %805 = vmatpush.msrb.mxu3 %v1133_v6 }
 0x6de   :  { %806 = vmatpush.msrb.mxu3 %v1141_v8 }
 0x75a   :  { %v428_v1 = vpop.f32.mrf.mxu3 }
 0x75b   :  { %v453_v3 = vadd.f32 %v1185_v11, %v428_v1  ;;  %v431_v7 = vadd.f32 %v428_v1, %v406_v5 }
 0x75d   :  { %455 = vrot.lane.b32.xlu1 %v453_v3, %s1075_s11  ;;  %v432_v58 = vadd.f32 %v431_v7, %v1195_v19  ;;  %v596_v7 = vpop.f32.mrf.mxu2 }
 0x75f   :  { %v891_v59 = vmul.f32 -1.442695, %v432_v58 }
 0x761   :  { %935 = vpow2.f32 %v891_v59 }
 0x767   :  { %v936_v60 = vpop.eup %935 }
 0x768   :  { %v436_v61 = vadd.f32 1.0, %v936_v60 }
 0x76a   :  { %937 = vrcp.f32 %v436_v61  ;;  %v448_v8 = vand.u32 2147483648, %v436_v61  ;;  %vm442_vm15 = vweird.f32 %v436_v61  ;;  %v446_v0 = vand.u32 2147483647, %v436_v61 }
 0x76c   :  { %v449_v10 = vor.u32 1.1754944e-38, %v448_v8  ;;  %vm447_vm3 = vcmp.eq.f32.partialorder %v446_v0, 8.507059e+37 }
 0x770   :  { %v938_v2 = vpop.eup %937 }
 0x771   :  { %v438_v4 = vmul.f32 %v938_v2, %v436_v61  ;;  %vm443_vm14 = vweird.f32 %v938_v2 }
 0x772   :  { %vm444_vm2 = vmor %vm442_vm15, %vm443_vm14 }
 0x773   :  { %v439_v62 = vsub.f32 1.0, %v438_v4 }
 0x775   :  { %v440_v6 = vmul.f32 %v938_v2, %v439_v62 }
 0x777   :  { %v441_v63 = vadd.f32 %v938_v2, %v440_v6 }
 0x779   :  { %v445_v9 = vsel %vm444_vm2, %v938_v2, %v441_v63 }
 0x77a   :  { %v450_v13 = vsel %vm447_vm3, %v449_v10, %v445_v9 }
 0x77b   :  { %v465_v20 = vsub.f32 1.0, %v450_v13  ;;  %v471_v22 = vmul.f32 %v450_v13, %v377_v55 }
 0x7cf   :  { %v456_v12 = vpop.permute.xlu1 %455 }
 0x7d0   :  { %v458_v14 = vmul.f32 %v456_v12, %v450_v13 }
 0x7d2   :  { %460 = vrot.lane.b32.xlu2 %v458_v14, %s1075_s11 }
 0x82c   :  { %v461_v16 = vpop.permute.xlu2 %460 }
 0x82d   :  { %v463_v17 = vadd.f32 %v461_v16, %v452_v15  ;;  %v642_v16 = vadd.f32 %v1202_v36, %v596_v7 }
 0x82f   :  { %939 = vtanh.f32 %v463_v17 }
 0x835   :  { %v940_v18 = vpop.eup %939 }
 0x836   :  { %467 = vrot.lane.b32.xlu0 %v940_v18, %s1076_s17 }
 0x8a8   :  { %v468_v21 = vpop.permute.xlu0 %467 }
 0x8a9   :  { %v470_v23 = vmul.f32 %v468_v21, %v465_v20 }
 0x8ab   :  { %v472_v24 = vadd.f32 %v471_v22, %v470_v23 }
 0x8ad   :  { %474 = vrot.lane.b32.xlu1 %v472_v24, %s1076_s17 }
 0x91f   :  { %v475_v26 = vpop.permute.xlu1 %474 }
 0x920   :  { %478 = vst.msk [vmem:[#allocation9 + $0x6] sm:$0x3] %vm72_vm0, %v475_v26  ;;  %893 = vmatmul.msk.f32.vlgmr.msra.gmra.mxu1 %vm87_vm1, %v475_v26  ;;  %v670_v26 = vld [vmem:[#allocation3 + $0xc] sm:$0x3] }
 0x921   :  { %898 = vmatmul.msk.f32.vlgmr.msrb.gmra.mxu0 %vm87_vm1, %v670_v26 }
 0x99d   :  { %v523_v27 = vpop.f32.mrf.mxu1 }
 0x99e   :  { %v548_v28 = vadd.f32 %v1185_v11, %v523_v27  ;;  %v526_v30 = vadd.f32 %v523_v27, %v501_v29 }
 0x9a0   :  { %550 = vrot.lane.b32.xlu2 %v548_v28, %s1075_s11  ;;  %v527_v31 = vadd.f32 %v526_v30, %v1195_v19  ;;  %v691_v30 = vpop.f32.mrf.mxu0 }
 0x9a2   :  { %v894_v32 = vmul.f32 -1.442695, %v527_v31 }
 0x9a4   :  { %941 = vpow2.f32 %v894_v32 }
 0x9aa   :  { %v942_v33 = vpop.eup %941 }
 0x9ab   :  { %v531_v34 = vadd.f32 1.0, %v942_v33 }
 0x9ad   :  { %943 = vrcp.f32 %v531_v34  ;;  %v543_v41 = vand.u32 2147483648, %v531_v34  ;;  %vm537_vm5 = vweird.f32 %v531_v34  ;;  %v541_v42 = vand.u32 2147483647, %v531_v34 }
 0x9af   :  { %v544_v44 = vor.u32 1.1754944e-38, %v543_v41  ;;  %vm542_vm7 = vcmp.eq.f32.partialorder %v541_v42, 8.507059e+37 }
 0x9b3   :  { %v944_v35 = vpop.eup %943 }
 0x9b4   :  { %v533_v37 = vmul.f32 %v944_v35, %v531_v34  ;;  %vm538_vm4 = vweird.f32 %v944_v35 }
 0x9b5   :  { %vm539_vm6 = vmor %vm537_vm5, %vm538_vm4 }
 0x9b6   :  { %v534_v38 = vsub.f32 1.0, %v533_v37 }
 0x9b8   :  { %v535_v39 = vmul.f32 %v944_v35, %v534_v38 }
 0x9ba   :  { %v536_v40 = vadd.f32 %v944_v35, %v535_v39 }
 0x9bc   :  { %v540_v43 = vsel %vm539_vm6, %v944_v35, %v536_v40 }
 0x9bd   :  { %v545_v46 = vsel %vm542_vm7, %v544_v44, %v540_v43 }
 0x9be   :  { %v560_v52 = vsub.f32 1.0, %v545_v46  ;;  %v566_v54 = vmul.f32 %v545_v46, %v472_v24 }
 0x9fa   :  { %v551_v45 = vpop.permute.xlu2 %550 }
 0x9fb   :  { %v553_v47 = vmul.f32 %v551_v45, %v545_v46 }
 0x9fd   :  { %555 = vrot.lane.b32.xlu0 %v553_v47, %s1075_s11 }
 0xa6f   :  { %v556_v49 = vpop.permute.xlu0 %555 }
 0xa70   :  { %v558_v50 = vadd.f32 %v556_v49, %v547_v48  ;;  %v737_v49 = vadd.f32 %v1202_v36, %v691_v30 }
 0xa72   :  { %945 = vtanh.f32 %v558_v50 }
 0xa78   :  { %v946_v51 = vpop.eup %945 }
 0xa79   :  { %562 = vrot.lane.b32.xlu1 %v946_v51, %s1076_s17 }
 0xaeb   :  { %v563_v53 = vpop.permute.xlu1 %562 }
 0xaec   :  { %v565_v55 = vmul.f32 %v563_v53, %v560_v52 }
 0xaee   :  { %v567_v56 = vadd.f32 %v566_v54, %v565_v55 }
 0xaf0   :  { %569 = vrot.lane.b32.xlu2 %v567_v56, %s1076_s17 }
 0xb4a   :  { %v570_v1 = vpop.permute.xlu2 %569 }
 0xb4b   :  { %573 = vst.msk [vmem:[#allocation9 + $0x8] sm:$0x3] %vm72_vm0, %v570_v1  ;;  %896 = vmatmul.msk.f32.vlgmr.msra.gmra.mxu3 %vm87_vm1, %v570_v1  ;;  %v765_v1 = vld [vmem:[#allocation3 + $0xe] sm:$0x3] }
 0xb4c   :  { %901 = vmatmul.msk.f32.vlgmr.msrb.gmra.mxu2 %vm87_vm1, %v765_v1 }
 0xbce   :  { %v618_v3 = vpop.f32.mrf.mxu3 }
 0xbcf   :  { %v643_v5 = vadd.f32 %v1185_v11, %v618_v3  ;;  %v621_v58 = vadd.f32 %v618_v3, %v596_v7 }
 0xbd1   :  { %645 = vrot.lane.b32.xlu0 %v643_v5, %s1075_s11  ;;  %v622_v59 = vadd.f32 %v621_v58, %v1195_v19  ;;  %v786_v58 = vpop.f32.mrf.mxu2 }
 0xbd3   :  { %v897_v60 = vmul.f32 -1.442695, %v622_v59 }
 0xbd5   :  { %947 = vpow2.f32 %v897_v60 }
 0xbdb   :  { %v948_v61 = vpop.eup %947 }
 0xbdc   :  { %v626_v2 = vadd.f32 1.0, %v948_v61 }
 0xbde   :  { %949 = vrcp.f32 %v626_v2  ;;  %v638_v0 = vand.u32 2147483648, %v626_v2  ;;  %vm632_vm9 = vweird.f32 %v626_v2  ;;  %v636_v9 = vand.u32 2147483647, %v626_v2 }
 0xbe0   :  { %v639_v12 = vor.u32 1.1754944e-38, %v638_v0  ;;  %vm637_vm11 = vcmp.eq.f32.partialorder %v636_v9, 8.507059e+37 }
 0xbe4   :  { %v950_v4 = vpop.eup %949 }
 0xbe5   :  { %v628_v62 = vmul.f32 %v950_v4, %v626_v2  ;;  %vm633_vm8 = vweird.f32 %v950_v4 }
 0xbe6   :  { %vm634_vm10 = vmor %vm632_vm9, %vm633_vm8 }
 0xbe7   :  { %v629_v6 = vsub.f32 1.0, %v628_v62 }
 0xbe9   :  { %v630_v63 = vmul.f32 %v950_v4, %v629_v6 }
 0xbeb   :  { %v631_v8 = vadd.f32 %v950_v4, %v630_v63 }
 0xbed   :  { %v635_v10 = vsel %vm634_vm10, %v950_v4, %v631_v8 }
 0xbee   :  { %v640_v14 = vsel %vm637_vm11, %v639_v12, %v635_v10 }
 0xbef   :  { %v655_v21 = vsub.f32 1.0, %v640_v14  ;;  %v661_v23 = vmul.f32 %v640_v14, %v567_v56 }
 0xc43   :  { %v646_v13 = vpop.permute.xlu0 %645 }
 0xc44   :  { %v648_v15 = vmul.f32 %v646_v13, %v640_v14 }
 0xc46   :  { %650 = vrot.lane.b32.xlu1 %v648_v15, %s1075_s11  ;;  %v832_v15 = vadd.f32 %v1202_v36, %v786_v58 }
 0xcb8   :  { %v651_v17 = vpop.permute.xlu1 %650 }
 0xcb9   :  { %v653_v18 = vadd.f32 %v651_v17, %v642_v16 }
 0xcbb   :  { %951 = vtanh.f32 %v653_v18 }
 0xcc1   :  { %v952_v20 = vpop.eup %951 }
 0xcc2   :  { %657 = vrot.lane.b32.xlu2 %v952_v20, %s1076_s17 }
 0xd1c   :  { %v658_v22 = vpop.permute.xlu2 %657 }
 0xd1d   :  { %v660_v24 = vmul.f32 %v658_v22, %v655_v21 }
 0xd1f   :  { %v662_v25 = vadd.f32 %v661_v23, %v660_v24 }
 0xd21   :  { %664 = vrot.lane.b32.xlu0 %v662_v25, %s1076_s17 }
 0xd93   :  { %v665_v27 = vpop.permute.xlu0 %664 }
 0xd94   :  { %668 = vst.msk [vmem:[#allocation9 + $0xa] sm:$0x3] %vm72_vm0, %v665_v27  ;;  %899 = vmatmul.msk.f32.vlgmr.msrb.gmra.mxu1 %vm87_vm1, %v665_v27 }
 0xe11   :  { %v713_v28 = vpop.f32.mrf.mxu1 }
 0xe12   :  { %v738_v29 = vadd.f32 %v1185_v11, %v713_v28  ;;  %v716_v31 = vadd.f32 %v713_v28, %v691_v30 }
 0xe14   :  { %740 = vrot.lane.b32.xlu1 %v738_v29, %s1075_s11  ;;  %v717_v32 = vadd.f32 %v716_v31, %v1195_v19 }
 0xe16   :  { %v900_v33 = vmul.f32 -1.442695, %v717_v32 }
 0xe18   :  { %953 = vpow2.f32 %v900_v33 }
 0xe1e   :  { %v954_v34 = vpop.eup %953 }
 0xe1f   :  { %v721_v35 = vadd.f32 1.0, %v954_v34 }
 0xe21   :  { %955 = vrcp.f32 %v721_v35  ;;  %v733_v42 = vand.u32 2147483648, %v721_v35  ;;  %vm727_vm13 = vweird.f32 %v721_v35  ;;  %v731_v43 = vand.u32 2147483647, %v721_v35 }
 0xe23   :  { %v734_v45 = vor.u32 1.1754944e-38, %v733_v42  ;;  %vm732_vm15 = vcmp.eq.f32.partialorder %v731_v43, 8.507059e+37 }
 0xe27   :  { %v956_v37 = vpop.eup %955 }
 0xe28   :  { %v723_v38 = vmul.f32 %v956_v37, %v721_v35  ;;  %vm728_vm12 = vweird.f32 %v956_v37 }
 0xe29   :  { %vm729_vm14 = vmor %vm727_vm13, %vm728_vm12 }
 0xe2a   :  { %v724_v39 = vsub.f32 1.0, %v723_v38 }
 0xe2c   :  { %v725_v40 = vmul.f32 %v956_v37, %v724_v39 }
 0xe2e   :  { %v726_v41 = vadd.f32 %v956_v37, %v725_v40 }
 0xe30   :  { %v730_v44 = vsel %vm729_vm14, %v956_v37, %v726_v41 }
 0xe31   :  { %v735_v47 = vsel %vm732_vm15, %v734_v45, %v730_v44 }
 0xe32   :  { %v750_v53 = vsub.f32 1.0, %v735_v47  ;;  %v756_v55 = vmul.f32 %v735_v47, %v662_v25 }
 0xe86   :  { %v741_v46 = vpop.permute.xlu1 %740 }
 0xe87   :  { %v743_v48 = vmul.f32 %v741_v46, %v735_v47 }
 0xe89   :  { %745 = vrot.lane.b32.xlu2 %v743_v48, %s1075_s11 }
 0xee3   :  { %v746_v50 = vpop.permute.xlu2 %745 }
 0xee4   :  { %v748_v51 = vadd.f32 %v746_v50, %v737_v49 }
 0xee6   :  { %957 = vtanh.f32 %v748_v51 }
 0xeec   :  { %v958_v52 = vpop.eup %957 }
 0xeed   :  { %752 = vrot.lane.b32.xlu0 %v958_v52, %s1076_s17 }
 0xf5f   :  { %v753_v54 = vpop.permute.xlu0 %752 }
 0xf60   :  { %v755_v56 = vmul.f32 %v753_v54, %v750_v53 }
 0xf62   :  { %v757_v57 = vadd.f32 %v756_v55, %v755_v56 }
 0xf64   :  { %759 = vrot.lane.b32.xlu1 %v757_v57, %s1076_s17 }
 0xfd6   :  { %v760_v3 = vpop.permute.xlu1 %759 }
 0xfd7   :  { %763 = vst.msk [vmem:[#allocation9 + $0xc] sm:$0x3] %vm72_vm0, %v760_v3  ;;  %902 = vmatmul.msk.f32.vlgmr.msrb.gmra.mxu3 %vm87_vm1, %v760_v3 }
0x105a   :  { %v808_v5 = vpop.f32.mrf.mxu3 }
0x105b   :  { %v833_v7 = vadd.f32 %v1185_v11, %v808_v5  ;;  %v811_v59 = vadd.f32 %v808_v5, %v786_v58 }
0x105d   :  { %835 = vrot.lane.b32.xlu2 %v833_v7, %s1075_s11  ;;  %v812_v60 = vadd.f32 %v811_v59, %v1195_v19 }
0x105f   :  { %v903_v61 = vmul.f32 -1.442695, %v812_v60 }
0x1061   :  { %959 = vpow2.f32 %v903_v61 }
0x1067   :  { %v960_v2 = vpop.eup %959 }
0x1068   :  { %v816_v4 = vadd.f32 1.0, %v960_v2 }
0x106a   :  { %961 = vrcp.f32 %v816_v4  ;;  %v828_v9 = vand.u32 2147483648, %v816_v4  ;;  %vm822_vm2 = vweird.f32 %v816_v4  ;;  %v826_v11 = vand.u32 2147483647, %v816_v4 }
0x106c   :  { %v829_v12 = vor.u32 1.1754944e-38, %v828_v9  ;;  %vm827_vm4 = vcmp.eq.f32.partialorder %v826_v11, 8.507059e+37 }
0x1070   :  { %v962_v62 = vpop.eup %961 }
0x1071   :  { %v818_v6 = vmul.f32 %v962_v62, %v816_v4  ;;  %vm823_vm1 = vweird.f32 %v962_v62 }
0x1072   :  { %vm824_vm3 = vmor %vm822_vm2, %vm823_vm1 }
0x1073   :  { %v819_v63 = vsub.f32 1.0, %v818_v6 }
0x1075   :  { %v820_v8 = vmul.f32 %v962_v62, %v819_v63 }
0x1077   :  { %v821_v0 = vadd.f32 %v962_v62, %v820_v8 }
0x1079   :  { %v825_v10 = vsel %vm824_vm3, %v962_v62, %v821_v0 }
0x107a   :  { %v830_v19 = vsel %vm827_vm4, %v829_v12, %v825_v10 }
0x107b   :  { %v845_v20 = vsub.f32 1.0, %v830_v19  ;;  %v851_v22 = vmul.f32 %v830_v19, %v757_v57 }
0x10b7   :  { %v836_v13 = vpop.permute.xlu2 %835 }
0x10b8   :  { %v838_v14 = vmul.f32 %v836_v13, %v830_v19 }
0x10ba   :  { %840 = vrot.lane.b32.xlu0 %v838_v14, %s1075_s11 }
0x112c   :  { %v841_v16 = vpop.permute.xlu0 %840 }
0x112d   :  { %v843_v17 = vadd.f32 %v841_v16, %v832_v15 }
0x112f   :  { %963 = vtanh.f32 %v843_v17 }
0x1135   :  { %v964_v18 = vpop.eup %963 }
0x1136   :  { %847 = vrot.lane.b32.xlu1 %v964_v18, %s1076_s17 }
0x11a8   :  { %v848_v21 = vpop.permute.xlu1 %847 }
0x11a9   :  { %v850_v23 = vmul.f32 %v848_v21, %v845_v20 }
0x11ab   :  { %v852_v24 = vadd.f32 %v851_v22, %v850_v23 }
0x11ad   :  { %854 = vrot.lane.b32.xlu2 %v852_v24, %s1076_s17 }
0x1207   :  { %v855_v36 = vpop.permute.xlu2 %854 }
0x1208   :  { %858 = vst.msk [vmem:[#allocation9 + $0xe] sm:$0x3] %vm72_vm0, %v855_v36 }
0x1209   :  { %859 = vst.msk [vmem:[#allocation2] sm:$0x3] %vm72_vm0, %v855_v36  ;;  %872 = dma.vmem_to_hbm [thread:$0]  %s865_s18, 256, %s867_s21, [#allocation5], %s1071_s30, %s1071_s30, %s1072_s6  }
0x120a   :  { %1065 = dma.done.wait [#allocation5], 256  }
0x120b   :  { %1066 = vsyncadd [#allocation5], 4294967040 }
0x120c   :  { %877 = vsyncpa [#allocation4], 1 }
0x120d   :  { %878 = vsyncpa [#allocation7], 1 }
0x120e   :  { %879 = vsyncpa [#allocation5], 1 }

</bundles_post_ra>
